<compile_context>
chip_gen: v7x
topology: tpu7x:2x2x1
jax: 0.10.0
libtpu: 0.0.40
codegen_flags: <defaults>
</compile_context>

<pallas_src>
import functools

import jax
import jax.numpy as jnp
import numpy as np
from jax.experimental import pallas as pl
from jax.experimental.pallas import tpu as pltpu


def lstm_kernel(x_ref, wg_ref, wh_ref, out_ref):
    # Shapes are static at trace time; derive all sizes from the refs.
    S, D_in = x_ref.shape
    H = wg_ref.shape[1] // 4          # w_gates is (D_in + H + 1, 4H)

    # --- Unpack the packed gate-path weights once (static, aligned slices). ---
    wg = wg_ref[...]
    w_ih = wg[:D_in, :]                          # (D_in, 4H)
    w_hh = wg[D_in:D_in + H, :]                  # (H, 4H)   -- hoisted
    b = wg[D_in + H:D_in + H + 1, :]             # (1, 4H)   = b_ih + b_hh

    # Hot path 1: all input-to-hidden gate projections as one MXU matmul.
    # x_gates: (S, 4H) -- with S=8, 4H=128 this is exactly one f32 vreg.
    x_gates = (
        jnp.dot(x_ref[...], w_ih, preferred_element_type=jnp.float32) + b
    )

    # Materialize every per-step row extract BEFORE the recurrence so the XLU
    # sublane shuffles run in the prologue, not on step t's dependency chain.
    xg = [x_gates[t:t + 1, :] for t in range(S)]

    h = jnp.zeros((1, H), jnp.float32)
    c = jnp.zeros((1, H), jnp.float32)

    # Fully-unrolled recurrence: S is a static, tiny trip count, so a Python
    # loop gives the scheduler full visibility and every slice is static.
    # No pl.delay / barriers / scratch -- pure compute chain.
    for t in range(S):
        gates = xg[t] + jnp.dot(
            h, w_hh, preferred_element_type=jnp.float32
        )  # (1, 4H)

        # Two full-vreg transcendental passes (independent; pipeline in the
        # single EUP) instead of four lane-sliced ones.
        sig = jax.nn.sigmoid(gates)  # (1, 4H)
        tnh = jnp.tanh(gates)        # (1, 4H)

        # PyTorch gate order: [input, forget, cell(g), output].
        i = sig[:, 0 * H:1 * H]
        f = sig[:, 1 * H:2 * H]
        g = tnh[:, 2 * H:3 * H]
        o = sig[:, 3 * H:4 * H]

        c = f * c + i * g
        h = o * jnp.tanh(c)

    # --- Linear head on the last hidden state only (= y_pred[-1]). ---
    w_lin = wh_ref[:H, :]            # (H, D_out)
    b_lin = wh_ref[H:H + 1, :]       # (1, D_out)
    out_ref[...] = (
        jnp.dot(h, w_lin, preferred_element_type=jnp.float32) + b_lin
    )


@functools.partial(jax.jit, static_argnames=())
def lstm_forward(x, w_gates, w_head):
    D_out = w_head.shape[1]
    vmem_spec = pl.BlockSpec(memory_space=pltpu.MemorySpace.VMEM)
    return pl.pallas_call(
        lstm_kernel,
        out_shape=jax.ShapeDtypeStruct((1, D_out), jnp.float32),
        in_specs=[vmem_spec] * 3,
        out_specs=vmem_spec,
    )(x, w_gates, w_head)


def pack_params(w_ih, w_hh, b_ih, b_hh, w_lin, b_lin):
    """Pack the six PyTorch-shaped params into two kernel operands.

    w_gates = [w_ih.T ; w_hh.T ; (b_ih+b_hh)]  -> (D_in + H + 1, 4H)
    w_head  = [w_lin.T ; b_lin]                -> (H + 1, D_out)
    """
    b = (b_ih + b_hh).reshape(1, -1)
    w_gates = jnp.concatenate([w_ih.T, w_hh.T, b], axis=0)
    w_head = jnp.concatenate([w_lin.T, b_lin.reshape(1, -1)], axis=0)
    return w_gates, w_head


def lstm_reference(x, w_ih_t, w_hh_t, b, w_lin_t, b_lin):
    """Pure-JAX reference matching torch.nn.LSTM + Linear semantics."""
    S = x.shape[0]
    H = w_hh_t.shape[0]
    h = jnp.zeros((1, H), jnp.float32)
    c = jnp.zeros((1, H), jnp.float32)
    x_gates = x @ w_ih_t + b
    for t in range(S):
        gates = x_gates[t:t + 1] + h @ w_hh_t
        i = jax.nn.sigmoid(gates[:, 0 * H:1 * H])
        f = jax.nn.sigmoid(gates[:, 1 * H:2 * H])
        g = jnp.tanh(gates[:, 2 * H:3 * H])
        o = jax.nn.sigmoid(gates[:, 3 * H:4 * H])
        c = f * c + i * g
        h = o * jnp.tanh(c)
    return h @ w_lin_t + b_lin


if __name__ == "__main__":
    # Small shapes consistent with the module: seq=8, D_in=16, D_hidden=32, D_out=8
    S, D_in, D_hidden, D_out = 8, 16, 32, 8

    key = jax.random.PRNGKey(0)
    keys = jax.random.split(key, 8)
    bound = 1.0 / np.sqrt(D_hidden)

    # PyTorch-shaped parameters (deterministic init).
    w_ih = jax.random.uniform(keys[0], (4 * D_hidden, D_in), jnp.float32, -bound, bound)
    w_hh = jax.random.uniform(keys[1], (4 * D_hidden, D_hidden), jnp.float32, -bound, bound)
    b_ih = jax.random.uniform(keys[2], (4 * D_hidden,), jnp.float32, -bound, bound)
    b_hh = jax.random.uniform(keys[3], (4 * D_hidden,), jnp.float32, -bound, bound)
    w_lin = jax.random.uniform(keys[4], (D_out, D_hidden), jnp.float32, -bound, bound)
    b_lin = jax.random.uniform(keys[5], (D_out,), jnp.float32, -bound, bound)

    x = jax.random.normal(keys[6], (S, D_in), jnp.float32)  # input_seq (batch=1 squeezed)

    # Pack six tiny operands into three kernel inputs (x + 2 weight slabs).
    w_gates, w_head = pack_params(w_ih, w_hh, b_ih, b_hh, w_lin, b_lin)

    out = lstm_forward(x, w_gates, w_head)
    out = jax.block_until_ready(out)

    ref = lstm_reference(
        x, w_ih.T, w_hh.T, (b_ih + b_hh).reshape(1, -1), w_lin.T, b_lin.reshape(1, -1)
    )
    np.testing.assert_allclose(np.asarray(out), np.asarray(ref), rtol=1e-5, atol=1e-5)

    print("KERNEL_OK")
</pallas_src>

<mosaic_0001>
module attributes {stable_mosaic.version = 11 : i64} {
  func.func @lstm_kernel(%arg0: memref<8x16xf32, #tpu.memory_space<vmem>>, %arg1: memref<49x128xf32, #tpu.memory_space<vmem>>, %arg2: memref<33x8xf32, #tpu.memory_space<vmem>>, %arg3: memref<1x8xf32, #tpu.memory_space<vmem>>) attributes {dimension_semantics = [], scalar_prefetch = 0 : i64, scratch_operands = 0 : i64, tpu.core_type = #tpu.core_type<tc>} {
    %c0 = arith.constant 0 : index
    %c0_0 = arith.constant 0 : index
    %0 = vector.load %arg1[%c0, %c0_0] : memref<49x128xf32, #tpu.memory_space<vmem>>, vector<49x128xf32>
    %1 = vector.extract_strided_slice %0 {offsets = [0, 0], sizes = [16, 128], strides = [1, 1]} : vector<49x128xf32> to vector<16x128xf32>
    %2 = vector.extract_strided_slice %0 {offsets = [16, 0], sizes = [32, 128], strides = [1, 1]} : vector<49x128xf32> to vector<32x128xf32>
    %3 = vector.extract_strided_slice %0 {offsets = [48, 0], sizes = [1, 128], strides = [1, 1]} : vector<49x128xf32> to vector<1x128xf32>
    %c0_1 = arith.constant 0 : index
    %c0_2 = arith.constant 0 : index
    %4 = vector.load %arg0[%c0_1, %c0_2] : memref<8x16xf32, #tpu.memory_space<vmem>>, vector<8x16xf32>
    %cst = arith.constant dense<0.000000e+00> : vector<8x128xf32>
    %5 = tpu.matmul %4, %1, %cst {dimension_numbers = #tpu.dot_dimension_numbers<[1], [0], [0], [1], [0, 0, 1, 1], [], []>} : vector<8x16xf32>, vector<16x128xf32>, vector<8x128xf32> -> vector<8x128xf32>
    %6 = vector.broadcast %3 : vector<1x128xf32> to vector<8x128xf32>
    %7 = arith.addf %5, %6 : vector<8x128xf32>
    %8 = vector.extract_strided_slice %7 {offsets = [0, 0], sizes = [1, 128], strides = [1, 1]} : vector<8x128xf32> to vector<1x128xf32>
    %9 = vector.extract_strided_slice %7 {offsets = [1, 0], sizes = [1, 128], strides = [1, 1]} : vector<8x128xf32> to vector<1x128xf32>
    %10 = vector.extract_strided_slice %7 {offsets = [2, 0], sizes = [1, 128], strides = [1, 1]} : vector<8x128xf32> to vector<1x128xf32>
    %11 = vector.extract_strided_slice %7 {offsets = [3, 0], sizes = [1, 128], strides = [1, 1]} : vector<8x128xf32> to vector<1x128xf32>
    %12 = vector.extract_strided_slice %7 {offsets = [4, 0], sizes = [1, 128], strides = [1, 1]} : vector<8x128xf32> to vector<1x128xf32>
    %13 = vector.extract_strided_slice %7 {offsets = [5, 0], sizes = [1, 128], strides = [1, 1]} : vector<8x128xf32> to vector<1x128xf32>
    %14 = vector.extract_strided_slice %7 {offsets = [6, 0], sizes = [1, 128], strides = [1, 1]} : vector<8x128xf32> to vector<1x128xf32>
    %15 = vector.extract_strided_slice %7 {offsets = [7, 0], sizes = [1, 128], strides = [1, 1]} : vector<8x128xf32> to vector<1x128xf32>
    %cst_3 = arith.constant 0.000000e+00 : f32
    %16 = vector.broadcast %cst_3 : f32 to vector<1x32xf32>
    %cst_4 = arith.constant 0.000000e+00 : f32
    %17 = vector.broadcast %cst_4 : f32 to vector<1x32xf32>
    %cst_5 = arith.constant dense<0.000000e+00> : vector<1x128xf32>
    %18 = tpu.matmul %16, %2, %cst_5 {dimension_numbers = #tpu.dot_dimension_numbers<[1], [0], [0], [1], [0, 0, 1, 1], [], []>} : vector<1x32xf32>, vector<32x128xf32>, vector<1x128xf32> -> vector<1x128xf32>
    %19 = arith.addf %8, %18 : vector<1x128xf32>
    %20 = arith.negf %19 : vector<1x128xf32>
    %21 = math.exp %20 : vector<1x128xf32>
    %cst_6 = arith.constant 1.000000e+00 : f32
    %22 = vector.broadcast %cst_6 : f32 to vector<1x128xf32>
    %23 = arith.addf %22, %21 : vector<1x128xf32>
    %24 = arith.divf %22, %23 : vector<1x128xf32>
    %25 = math.tanh %19 : vector<1x128xf32>
    %26 = vector.extract_strided_slice %24 {offsets = [0, 0], sizes = [1, 32], strides = [1, 1]} : vector<1x128xf32> to vector<1x32xf32>
    %27 = vector.extract_strided_slice %24 {offsets = [0, 32], sizes = [1, 32], strides = [1, 1]} : vector<1x128xf32> to vector<1x32xf32>
    %28 = vector.extract_strided_slice %25 {offsets = [0, 64], sizes = [1, 32], strides = [1, 1]} : vector<1x128xf32> to vector<1x32xf32>
    %29 = vector.extract_strided_slice %24 {offsets = [0, 96], sizes = [1, 32], strides = [1, 1]} : vector<1x128xf32> to vector<1x32xf32>
    %30 = arith.mulf %27, %17 : vector<1x32xf32>
    %31 = arith.mulf %26, %28 : vector<1x32xf32>
    %32 = arith.addf %30, %31 : vector<1x32xf32>
    %33 = math.tanh %32 : vector<1x32xf32>
    %34 = arith.mulf %29, %33 : vector<1x32xf32>
    %cst_7 = arith.constant dense<0.000000e+00> : vector<1x128xf32>
    %35 = tpu.matmul %34, %2, %cst_7 {dimension_numbers = #tpu.dot_dimension_numbers<[1], [0], [0], [1], [0, 0, 1, 1], [], []>} : vector<1x32xf32>, vector<32x128xf32>, vector<1x128xf32> -> vector<1x128xf32>
    %36 = arith.addf %9, %35 : vector<1x128xf32>
    %37 = arith.negf %36 : vector<1x128xf32>
    %38 = math.exp %37 : vector<1x128xf32>
    %cst_8 = arith.constant 1.000000e+00 : f32
    %39 = vector.broadcast %cst_8 : f32 to vector<1x128xf32>
    %40 = arith.addf %39, %38 : vector<1x128xf32>
    %41 = arith.divf %39, %40 : vector<1x128xf32>
    %42 = math.tanh %36 : vector<1x128xf32>
    %43 = vector.extract_strided_slice %41 {offsets = [0, 0], sizes = [1, 32], strides = [1, 1]} : vector<1x128xf32> to vector<1x32xf32>
    %44 = vector.extract_strided_slice %41 {offsets = [0, 32], sizes = [1, 32], strides = [1, 1]} : vector<1x128xf32> to vector<1x32xf32>
    %45 = vector.extract_strided_slice %42 {offsets = [0, 64], sizes = [1, 32], strides = [1, 1]} : vector<1x128xf32> to vector<1x32xf32>
    %46 = vector.extract_strided_slice %41 {offsets = [0, 96], sizes = [1, 32], strides = [1, 1]} : vector<1x128xf32> to vector<1x32xf32>
    %47 = arith.mulf %44, %32 : vector<1x32xf32>
    %48 = arith.mulf %43, %45 : vector<1x32xf32>
    %49 = arith.addf %47, %48 : vector<1x32xf32>
    %50 = math.tanh %49 : vector<1x32xf32>
    %51 = arith.mulf %46, %50 : vector<1x32xf32>
    %cst_9 = arith.constant dense<0.000000e+00> : vector<1x128xf32>
    %52 = tpu.matmul %51, %2, %cst_9 {dimension_numbers = #tpu.dot_dimension_numbers<[1], [0], [0], [1], [0, 0, 1, 1], [], []>} : vector<1x32xf32>, vector<32x128xf32>, vector<1x128xf32> -> vector<1x128xf32>
    %53 = arith.addf %10, %52 : vector<1x128xf32>
    %54 = arith.negf %53 : vector<1x128xf32>
    %55 = math.exp %54 : vector<1x128xf32>
    %cst_10 = arith.constant 1.000000e+00 : f32
    %56 = vector.broadcast %cst_10 : f32 to vector<1x128xf32>
    %57 = arith.addf %56, %55 : vector<1x128xf32>
    %58 = arith.divf %56, %57 : vector<1x128xf32>
    %59 = math.tanh %53 : vector<1x128xf32>
    %60 = vector.extract_strided_slice %58 {offsets = [0, 0], sizes = [1, 32], strides = [1, 1]} : vector<1x128xf32> to vector<1x32xf32>
    %61 = vector.extract_strided_slice %58 {offsets = [0, 32], sizes = [1, 32], strides = [1, 1]} : vector<1x128xf32> to vector<1x32xf32>
    %62 = vector.extract_strided_slice %59 {offsets = [0, 64], sizes = [1, 32], strides = [1, 1]} : vector<1x128xf32> to vector<1x32xf32>
    %63 = vector.extract_strided_slice %58 {offsets = [0, 96], sizes = [1, 32], strides = [1, 1]} : vector<1x128xf32> to vector<1x32xf32>
    %64 = arith.mulf %61, %49 : vector<1x32xf32>
    %65 = arith.mulf %60, %62 : vector<1x32xf32>
    %66 = arith.addf %64, %65 : vector<1x32xf32>
    %67 = math.tanh %66 : vector<1x32xf32>
    %68 = arith.mulf %63, %67 : vector<1x32xf32>
    %cst_11 = arith.constant dense<0.000000e+00> : vector<1x128xf32>
    %69 = tpu.matmul %68, %2, %cst_11 {dimension_numbers = #tpu.dot_dimension_numbers<[1], [0], [0], [1], [0, 0, 1, 1], [], []>} : vector<1x32xf32>, vector<32x128xf32>, vector<1x128xf32> -> vector<1x128xf32>
    %70 = arith.addf %11, %69 : vector<1x128xf32>
    %71 = arith.negf %70 : vector<1x128xf32>
    %72 = math.exp %71 : vector<1x128xf32>
    %cst_12 = arith.constant 1.000000e+00 : f32
    %73 = vector.broadcast %cst_12 : f32 to vector<1x128xf32>
    %74 = arith.addf %73, %72 : vector<1x128xf32>
    %75 = arith.divf %73, %74 : vector<1x128xf32>
    %76 = math.tanh %70 : vector<1x128xf32>
    %77 = vector.extract_strided_slice %75 {offsets = [0, 0], sizes = [1, 32], strides = [1, 1]} : vector<1x128xf32> to vector<1x32xf32>
    %78 = vector.extract_strided_slice %75 {offsets = [0, 32], sizes = [1, 32], strides = [1, 1]} : vector<1x128xf32> to vector<1x32xf32>
    %79 = vector.extract_strided_slice %76 {offsets = [0, 64], sizes = [1, 32], strides = [1, 1]} : vector<1x128xf32> to vector<1x32xf32>
    %80 = vector.extract_strided_slice %75 {offsets = [0, 96], sizes = [1, 32], strides = [1, 1]} : vector<1x128xf32> to vector<1x32xf32>
    %81 = arith.mulf %78, %66 : vector<1x32xf32>
    %82 = arith.mulf %77, %79 : vector<1x32xf32>
    %83 = arith.addf %81, %82 : vector<1x32xf32>
    %84 = math.tanh %83 : vector<1x32xf32>
    %85 = arith.mulf %80, %84 : vector<1x32xf32>
    %cst_13 = arith.constant dense<0.000000e+00> : vector<1x128xf32>
    %86 = tpu.matmul %85, %2, %cst_13 {dimension_numbers = #tpu.dot_dimension_numbers<[1], [0], [0], [1], [0, 0, 1, 1], [], []>} : vector<1x32xf32>, vector<32x128xf32>, vector<1x128xf32> -> vector<1x128xf32>
    %87 = arith.addf %12, %86 : vector<1x128xf32>
    %88 = arith.negf %87 : vector<1x128xf32>
    %89 = math.exp %88 : vector<1x128xf32>
    %cst_14 = arith.constant 1.000000e+00 : f32
    %90 = vector.broadcast %cst_14 : f32 to vector<1x128xf32>
    %91 = arith.addf %90, %89 : vector<1x128xf32>
    %92 = arith.divf %90, %91 : vector<1x128xf32>
    %93 = math.tanh %87 : vector<1x128xf32>
    %94 = vector.extract_strided_slice %92 {offsets = [0, 0], sizes = [1, 32], strides = [1, 1]} : vector<1x128xf32> to vector<1x32xf32>
    %95 = vector.extract_strided_slice %92 {offsets = [0, 32], sizes = [1, 32], strides = [1, 1]} : vector<1x128xf32> to vector<1x32xf32>
    %96 = vector.extract_strided_slice %93 {offsets = [0, 64], sizes = [1, 32], strides = [1, 1]} : vector<1x128xf32> to vector<1x32xf32>
    %97 = vector.extract_strided_slice %92 {offsets = [0, 96], sizes = [1, 32], strides = [1, 1]} : vector<1x128xf32> to vector<1x32xf32>
    %98 = arith.mulf %95, %83 : vector<1x32xf32>
    %99 = arith.mulf %94, %96 : vector<1x32xf32>
    %100 = arith.addf %98, %99 : vector<1x32xf32>
    %101 = math.tanh %100 : vector<1x32xf32>
    %102 = arith.mulf %97, %101 : vector<1x32xf32>
    %cst_15 = arith.constant dense<0.000000e+00> : vector<1x128xf32>
    %103 = tpu.matmul %102, %2, %cst_15 {dimension_numbers = #tpu.dot_dimension_numbers<[1], [0], [0], [1], [0, 0, 1, 1], [], []>} : vector<1x32xf32>, vector<32x128xf32>, vector<1x128xf32> -> vector<1x128xf32>
    %104 = arith.addf %13, %103 : vector<1x128xf32>
    %105 = arith.negf %104 : vector<1x128xf32>
    %106 = math.exp %105 : vector<1x128xf32>
    %cst_16 = arith.constant 1.000000e+00 : f32
    %107 = vector.broadcast %cst_16 : f32 to vector<1x128xf32>
    %108 = arith.addf %107, %106 : vector<1x128xf32>
    %109 = arith.divf %107, %108 : vector<1x128xf32>
    %110 = math.tanh %104 : vector<1x128xf32>
    %111 = vector.extract_strided_slice %109 {offsets = [0, 0], sizes = [1, 32], strides = [1, 1]} : vector<1x128xf32> to vector<1x32xf32>
    %112 = vector.extract_strided_slice %109 {offsets = [0, 32], sizes = [1, 32], strides = [1, 1]} : vector<1x128xf32> to vector<1x32xf32>
    %113 = vector.extract_strided_slice %110 {offsets = [0, 64], sizes = [1, 32], strides = [1, 1]} : vector<1x128xf32> to vector<1x32xf32>
    %114 = vector.extract_strided_slice %109 {offsets = [0, 96], sizes = [1, 32], strides = [1, 1]} : vector<1x128xf32> to vector<1x32xf32>
    %115 = arith.mulf %112, %100 : vector<1x32xf32>
    %116 = arith.mulf %111, %113 : vector<1x32xf32>
    %117 = arith.addf %115, %116 : vector<1x32xf32>
    %118 = math.tanh %117 : vector<1x32xf32>
    %119 = arith.mulf %114, %118 : vector<1x32xf32>
    %cst_17 = arith.constant dense<0.000000e+00> : vector<1x128xf32>
    %120 = tpu.matmul %119, %2, %cst_17 {dimension_numbers = #tpu.dot_dimension_numbers<[1], [0], [0], [1], [0, 0, 1, 1], [], []>} : vector<1x32xf32>, vector<32x128xf32>, vector<1x128xf32> -> vector<1x128xf32>
    %121 = arith.addf %14, %120 : vector<1x128xf32>
    %122 = arith.negf %121 : vector<1x128xf32>
    %123 = math.exp %122 : vector<1x128xf32>
    %cst_18 = arith.constant 1.000000e+00 : f32
    %124 = vector.broadcast %cst_18 : f32 to vector<1x128xf32>
    %125 = arith.addf %124, %123 : vector<1x128xf32>
    %126 = arith.divf %124, %125 : vector<1x128xf32>
    %127 = math.tanh %121 : vector<1x128xf32>
    %128 = vector.extract_strided_slice %126 {offsets = [0, 0], sizes = [1, 32], strides = [1, 1]} : vector<1x128xf32> to vector<1x32xf32>
    %129 = vector.extract_strided_slice %126 {offsets = [0, 32], sizes = [1, 32], strides = [1, 1]} : vector<1x128xf32> to vector<1x32xf32>
    %130 = vector.extract_strided_slice %127 {offsets = [0, 64], sizes = [1, 32], strides = [1, 1]} : vector<1x128xf32> to vector<1x32xf32>
    %131 = vector.extract_strided_slice %126 {offsets = [0, 96], sizes = [1, 32], strides = [1, 1]} : vector<1x128xf32> to vector<1x32xf32>
    %132 = arith.mulf %129, %117 : vector<1x32xf32>
    %133 = arith.mulf %128, %130 : vector<1x32xf32>
    %134 = arith.addf %132, %133 : vector<1x32xf32>
    %135 = math.tanh %134 : vector<1x32xf32>
    %136 = arith.mulf %131, %135 : vector<1x32xf32>
    %cst_19 = arith.constant dense<0.000000e+00> : vector<1x128xf32>
    %137 = tpu.matmul %136, %2, %cst_19 {dimension_numbers = #tpu.dot_dimension_numbers<[1], [0], [0], [1], [0, 0, 1, 1], [], []>} : vector<1x32xf32>, vector<32x128xf32>, vector<1x128xf32> -> vector<1x128xf32>
    %138 = arith.addf %15, %137 : vector<1x128xf32>
    %139 = arith.negf %138 : vector<1x128xf32>
    %140 = math.exp %139 : vector<1x128xf32>
    %cst_20 = arith.constant 1.000000e+00 : f32
    %141 = vector.broadcast %cst_20 : f32 to vector<1x128xf32>
    %142 = arith.addf %141, %140 : vector<1x128xf32>
    %143 = arith.divf %141, %142 : vector<1x128xf32>
    %144 = math.tanh %138 : vector<1x128xf32>
    %145 = vector.extract_strided_slice %143 {offsets = [0, 0], sizes = [1, 32], strides = [1, 1]} : vector<1x128xf32> to vector<1x32xf32>
    %146 = vector.extract_strided_slice %143 {offsets = [0, 32], sizes = [1, 32], strides = [1, 1]} : vector<1x128xf32> to vector<1x32xf32>
    %147 = vector.extract_strided_slice %144 {offsets = [0, 64], sizes = [1, 32], strides = [1, 1]} : vector<1x128xf32> to vector<1x32xf32>
    %148 = vector.extract_strided_slice %143 {offsets = [0, 96], sizes = [1, 32], strides = [1, 1]} : vector<1x128xf32> to vector<1x32xf32>
    %149 = arith.mulf %146, %134 : vector<1x32xf32>
    %150 = arith.mulf %145, %147 : vector<1x32xf32>
    %151 = arith.addf %149, %150 : vector<1x32xf32>
    %152 = math.tanh %151 : vector<1x32xf32>
    %153 = arith.mulf %148, %152 : vector<1x32xf32>
    %c0_21 = arith.constant 0 : index
    %c0_22 = arith.constant 0 : index
    %154 = vector.load %arg2[%c0_21, %c0_22] : memref<33x8xf32, #tpu.memory_space<vmem>>, vector<32x8xf32>
    %c32 = arith.constant 32 : index
    %c0_23 = arith.constant 0 : index
    %155 = vector.load %arg2[%c32, %c0_23] : memref<33x8xf32, #tpu.memory_space<vmem>>, vector<1x8xf32>
    %cst_24 = arith.constant dense<0.000000e+00> : vector<1x8xf32>
    %156 = tpu.matmul %153, %154, %cst_24 {dimension_numbers = #tpu.dot_dimension_numbers<[1], [0], [0], [1], [0, 0, 1, 1], [], []>} : vector<1x32xf32>, vector<32x8xf32>, vector<1x8xf32> -> vector<1x8xf32>
    %157 = arith.addf %156, %155 : vector<1x8xf32>
    %c0_25 = arith.constant 0 : index
    %c0_26 = arith.constant 0 : index
    %158 = vector.load %arg3[%c0_25, %c0_26] : memref<1x8xf32, #tpu.memory_space<vmem>>, vector<1x8xf32>
    tpu.vector_store %arg3[%c0_25, %c0_26], %157 {strides = array<i32>} : memref<1x8xf32, #tpu.memory_space<vmem>>, vector<1x8xf32>,
    return
  }
}

</mosaic_0001>

<bundles_post_ra>
// kernel: lstm_forward.1
= control target key start
LH: loop header
LB: loop body
LE: loop exit
PB: predicated region body
PF: predicated region fallthrough
CT: control target
= control target key end

     0   :  { %8 = vsyncpa [#allocation3], 0  ;;  %s1591_s0 = inlined_call_operand.vmem [shape: f32[8,16], index: 0, kind: input, shape index: {}]   ;;  %s1592_s1 = inlined_call_operand.hbm [shape: f32[49,128], index: 1, kind: input, shape index: {}]   ;;  %s1593_s2 = inlined_call_operand.vmem [shape: f32[33,8], index: 2, kind: input, shape index: {}]   ;;  %s1594_s3 = inlined_call_operand.hbm [shape: f32[1,8], index: 3, kind: output, shape index: {}]  }
   0x1   :  { %9 = vsyncpa [#allocation4], 0  ;;  %s1410_s12 = smov [#allocation2]   ;;  %s1362_s16 = scalar_lea.hbm %s1592_s1, 896 }
   0x2   :  { %s17_s13 = sshll.u32 %s1410_s12, 4  ;;  %p1363_p0 = scmp.ne.s32.totalorder %s1592_s1, %s1362_s16  ;;  %s18_s13 = int_to_ptr.vmem [resolvable:$true] %s17_s13 }
   0x3   :  { %p1366_p1 = scmp.lt.u32.totalorder %s1362_s16, %s1592_s1 }
   0x5   :  { %p1368_p2 = pnand %p1366_p1, %p1363_p0 }
   0x7   :  { %1371 = shalt.err (!%p1368_p2)
}
   0x8   :  { %s1372_s21 = scalar_lea.vmem %s18_s13, 896  ;;  %p1377_p4 = scmp.lt.s32.totalorder %s18_s13, %s18_s13 }
   0x9   :  { %p1373_p3 = scmp.ne.s32.totalorder %s18_s13, %s1372_s21  ;;  %p1378_p5 = scmp.lt.s32.totalorder %s1372_s21, %s1372_s21 }
   0xb   :  { %p1379_p6 = por %p1378_p5, %p1377_p4 }
   0xd   :  { %p1380_p7 = pnand %p1379_p6, %p1373_p3 }
   0xf   :  { %1383 = shalt.err (!%p1380_p7)
}
  0x10   :  { %s1411_s22 = smov 128   ;;  %s1412_s23 = smov 8  }
  0x11   :  { %23 = dma.hbm_to_vmem [thread:$0]  %s1592_s1, 896, %s18_s13, [#allocation3], %s1411_s22, %s1411_s22, %s1412_s23  }
  0x12   :  { %1406 = dma.done.wait [#allocation3], 896  }
  0x13   :  { %1407 = vsyncadd [#allocation3], 4294966400  ;;  %v1413_v0 = vmov 0.0|0.0   ;;  %vm1414_vm0 = vmmov 0   ;;  %v1415_v1 = vmov 0.0   ;;  %v31_v2 = vld [vmem:[#allocation2 + $0x10] sm:$0xff] }
  0x14   :  { %1235 = vmatprep.subr.bf16.mxu1 %v1413_v0  ;;  %1232 = vmatprep.subr.bf16.mxu0 %v1413_v0  ;;  %v32_v3 = vld [vmem:[#allocation2 + $0x18] sm:$0xff]  ;;  %v29_v4 = vld [vmem:[#allocation2] sm:$0xff]  ;;  %v30_v6 = vld [vmem:[#allocation2 + $0x8] sm:$0xff]  ;;  %vm41_vm1 = vcmask 130048   ;;  %s1417_s27 = smov 32   ;;  %vm115_vm2 = vcmask 261120  }
  0x15   :  { %1130 = vmatprep.mubr.msk.f32.mxu0 %vm1414_vm0, %v1415_v1  ;;  %1141 = vmatprep.mubr.msk.f32.mxu1 %vm1414_vm0, %v1415_v1  ;;  %v1457_v5 = vpack.c.bf16 %v32_v3, %v31_v2  ;;  %v33_v7 = vld [vmem:[#allocation2 + $0x20] sm:$0xff]  ;;  %v1233_v8 = vpack.c.bf16 %v30_v6, %v29_v4  ;;  %v34_v9 = vld [vmem:[#allocation2 + $0x28] sm:$0xff]  ;;  %v1060_v12 = vld [vmem:[#allocation2 + $0x30] ss:$0 sm:$0xff]  ;;  %s1418_s11 = smov [#allocation5]   ;;  %vm1043_vm3 = vcmask 57344  }
  0x16   :  { %v1460_v10 = vpack.c.bf16 %v34_v9, %v33_v7  ;;  %v36_v11 = vld [vmem:[%s1591_s0] sm:$0xff]  ;;  %s1416_s0 = smov 64   ;;  %s1051_s12 = sshll.u32 %s1418_s11, 4  ;;  %s1052_s12 = int_to_ptr.vmem [resolvable:$true] %s1051_s12 }
  0x17   :  { %1237 = vmatpush3.bf16.msra.mxu1 %v1457_v5  ;;  %1234 = vmatpush3.bf16.msra.mxu0 %v1233_v8  ;;  %s1384_s13 = scalar_lea.vmem %s1052_s12, 16  ;;  %s1388_s14 = scalar_lea.vmem %s1052_s12, 32 }
  0x18   :  { %1238 = vmatprep.subr.bf16.mxu1 %v1413_v0  ;;  %1241 = vmatprep.subr.bf16.mxu0 %v1413_v0  ;;  %p1385_p8 = scmp.ne.s32.totalorder %s1052_s12, %s1384_s13  ;;  %p1389_p9 = scmp.lt.s32.totalorder %s1052_s12, %s1052_s12 }
  0x19   :  { %p1390_p10 = scmp.lt.s32.totalorder %s1388_s14, %s1384_s13 }
  0x1a   :  { %1131 = vmatmul.mubr.msk.f32.vlgmr.msra.gmra.mrb[0].mxu0 %vm41_vm1, %v36_v11 }
  0x1b   :  { %1240 = vmatpush3.bf16.msra.mxu1 %v1460_v10  ;;  %1243 = vmatpush3.bf16.msra.mxu0 %v1457_v5  ;;  %p1391_p11 = por %p1390_p10, %p1389_p9 }
  0x1c   :  { %1152 = vmatprep.mubr.msk.f32.mxu0 %vm1414_vm0, %v1415_v1  ;;  %1244 = vmatprep.subr.bf16.mxu0 %v1413_v0 }
  0x1d   :  { %1247 = vmatprep.subr.bf16.mxu1 %v1413_v0  ;;  %p1392_p12 = pnand %p1391_p11, %p1385_p8 }
  0x1e   :  { %1142 = vmatmul.mubr.f32.vlgmr.msra.gmra.mrb[0].mxu1 %v1415_v1 }
  0x1f   :  { %1249 = vmatpush3.bf16.msra.mxu1 %v1457_v5  ;;  %1163 = vmatprep.mubr.msk.f32.mxu1 %vm1414_vm0, %v1415_v1 }
  0x20   :  { %1246 = vmatpush3.bf16.msra.mxu0 %v1460_v10  ;;  %1250 = vmatprep.subr.bf16.mxu1 %v1413_v0 }
  0x21   :  { %1253 = vmatprep.subr.bf16.mxu0 %v1413_v0 }
  0x23   :  { %1252 = vmatpush3.bf16.msra.mxu1 %v1460_v10 }
  0x24   :  { %1259 = vmatprep.subr.bf16.mxu1 %v1413_v0 }
  0xed   :  { %v111_v13 = vpop.f32.mrb[0].mxu0 }
  0xee   :  { %v1482_v14 = vadd.f32 %v1060_v12, %v111_v13  ;;  %v1132_v15 = vpop.f32.mrb[1].mxu0 }
  0xf1   :  { %v185_v16 = vpop.f32.mrb[0].mxu1 }
  0xf2   :  { %v189_v17 = vadd.f32 %v185_v16, %v1482_v14  ;;  %v1143_v18 = vpop.f32.mrb[1].mxu1 }
  0xf4   :  { %1298 = vtanh.f32 %v189_v17  ;;  %v1062_v20 = vmul.f32 -1.442695, %v189_v17 }
  0xf6   :  { %1300 = vpow2.f32 %v1062_v20 }
  0xfe   :  { %v1299_v19 = vpop.eup %1298 }
  0xff   :  { %199 = vrot.lane.b32.xlu0 %v1299_v19, %s1416_s0 }
 0x100   :  { %v1301_v21 = vpop.eup %1300 }
 0x101   :  { %v193_v22 = vadd.f32 1.0, %v1301_v21 }
 0x103   :  { %1302 = vrcp.f32 %v193_v22 }
 0x10d   :  { %v1303_v23 = vpop.eup %1302 }
 0x10e   :  { %v197_v26 = vmul.f32 0.0, %v1303_v23 }
 0x171   :  { %v200_v24 = vpop.permute.xlu0 %199 }
 0x172   :  { %v202_v25 = vmul.f32 %v1303_v23, %v200_v24 }
 0x174   :  { %204 = vrot.lane.b32.xlu0 %v202_v25, %s1417_s27 }
 0x1e6   :  { %v205_v27 = vpop.permute.xlu0 %204 }
 0x1e7   :  { %v207_v28 = vadd.f32 %v205_v27, %v197_v26 }
 0x1e9   :  { %1304 = vtanh.f32 %v207_v28  ;;  %v301_v44 = vrot.slane %v207_v28, 7 }
 0x1f3   :  { %v1305_v29 = vpop.eup %1304 }
 0x1f4   :  { %210 = vrot.lane.b32.xlu1 %v1305_v29, %s1416_s0 }
 0x266   :  { %v211_v30 = vpop.permute.xlu1 %210 }
 0x267   :  { %v213_v31 = vmul.f32 %v1303_v23, %v211_v30 }
 0x269   :  { %215 = vrot.lane.b32.xlu1 %v213_v31, %s1417_s27 }
 0x2db   :  { %v216_v32 = vpop.permute.xlu1 %215 }
 0x2dc   :  { %1153 = vmatmul.mubr.msk.f32.vlgmr.msra.gmra.mrb[2].mxu0 %vm115_vm2, %v216_v32 }
 0x2dd   :  { %1255 = vmatpush3.bf16.msra.mxu0 %v1457_v5  ;;  %1174 = vmatprep.mubr.msk.f32.mxu0 %vm1414_vm0, %v1415_v1 }
 0x2de   :  { %1256 = vmatprep.subr.bf16.mxu0 %v1413_v0 }
 0x2e1   :  { %1258 = vmatpush3.bf16.msra.mxu0 %v1460_v10 }
 0x2e2   :  { %1265 = vmatprep.subr.bf16.mxu0 %v1413_v0 }
 0x3af   :  { %v285_v33 = vpop.f32.mrb[2].mxu0 }
 0x3b0   :  { %v290_v34 = vrot.slane %v285_v33, 7  ;;  %v1154_v35 = vpop.f32.mrb[3].mxu0 }
 0x3b2   :  { %v292_v36 = vadd.f32 %v290_v34, %v1482_v14 }
 0x3b4   :  { %1306 = vtanh.f32 %v292_v36  ;;  %v1064_v38 = vmul.f32 -1.442695, %v292_v36 }
 0x3b6   :  { %1308 = vpow2.f32 %v1064_v38 }
 0x3be   :  { %v1307_v37 = vpop.eup %1306 }
 0x3bf   :  { %305 = vrot.lane.b32.xlu0 %v1307_v37, %s1416_s0 }
 0x3c0   :  { %v1309_v39 = vpop.eup %1308 }
 0x3c1   :  { %v296_v40 = vadd.f32 1.0, %v1309_v39 }
 0x3c3   :  { %1310 = vrcp.f32 %v296_v40 }
 0x3cd   :  { %v1311_v41 = vpop.eup %1310 }
 0x3ce   :  { %v303_v45 = vmul.f32 %v1311_v41, %v301_v44 }
 0x431   :  { %v306_v42 = vpop.permute.xlu0 %305 }
 0x432   :  { %v308_v43 = vmul.f32 %v1311_v41, %v306_v42 }
 0x434   :  { %310 = vrot.lane.b32.xlu1 %v308_v43, %s1417_s27 }
 0x4a6   :  { %v311_v46 = vpop.permute.xlu1 %310 }
 0x4a7   :  { %v313_v47 = vadd.f32 %v311_v46, %v303_v45 }
 0x4a9   :  { %1312 = vtanh.f32 %v313_v47  ;;  %v408_v2 = vrot.slane %v313_v47, 7 }
 0x4b3   :  { %v1313_v48 = vpop.eup %1312 }
 0x4b4   :  { %316 = vrot.lane.b32.xlu0 %v1313_v48, %s1416_s0 }
 0x526   :  { %v317_v49 = vpop.permute.xlu0 %316 }
 0x527   :  { %v319_v50 = vmul.f32 %v1311_v41, %v317_v49 }
 0x529   :  { %v321_v51 = vrot.slane %v319_v50, 1 }
 0x52b   :  { %322 = vrot.lane.b32.xlu1 %v321_v51, %s1417_s27 }
 0x59d   :  { %v323_v52 = vpop.permute.xlu1 %322 }
 0x59e   :  { %1164 = vmatmul.mubr.msk.f32.vlgmr.msra.gmra.mrb[2].mxu1 %vm115_vm2, %v323_v52 }
 0x59f   :  { %1261 = vmatpush3.bf16.msra.mxu1 %v1457_v5  ;;  %1185 = vmatprep.mubr.msk.f32.mxu1 %vm1414_vm0, %v1415_v1 }
 0x5a0   :  { %1262 = vmatprep.subr.bf16.mxu1 %v1413_v0 }
 0x5a3   :  { %1264 = vmatpush3.bf16.msra.mxu1 %v1460_v10 }
 0x5a4   :  { %1271 = vmatprep.subr.bf16.mxu1 %v1413_v0 }
 0x671   :  { %v392_v53 = vpop.f32.mrb[2].mxu1 }
 0x672   :  { %v397_v54 = vrot.slane %v392_v53, 6  ;;  %v1165_v55 = vpop.f32.mrb[3].mxu1 }
 0x674   :  { %v399_v56 = vadd.f32 %v397_v54, %v1482_v14 }
 0x676   :  { %1314 = vtanh.f32 %v399_v56  ;;  %v1066_v58 = vmul.f32 -1.442695, %v399_v56 }
 0x678   :  { %1316 = vpow2.f32 %v1066_v58 }
 0x680   :  { %v1315_v57 = vpop.eup %1314 }
 0x681   :  { %412 = vrot.lane.b32.xlu0 %v1315_v57, %s1416_s0 }
 0x682   :  { %v1317_v59 = vpop.eup %1316 }
 0x683   :  { %v403_v60 = vadd.f32 1.0, %v1317_v59 }
 0x685   :  { %1318 = vrcp.f32 %v403_v60 }
 0x68f   :  { %v1319_v61 = vpop.eup %1318 }
 0x690   :  { %v410_v3 = vmul.f32 %v1319_v61, %v408_v2 }
 0x6f3   :  { %v413_v62 = vpop.permute.xlu0 %412 }
 0x6f4   :  { %v415_v63 = vmul.f32 %v1319_v61, %v413_v62 }
 0x6f6   :  { %417 = vrot.lane.b32.xlu1 %v415_v63, %s1417_s27 }
 0x768   :  { %v418_v4 = vpop.permute.xlu1 %417 }
 0x769   :  { %v420_v6 = vadd.f32 %v418_v4, %v410_v3 }
 0x76b   :  { %1320 = vtanh.f32 %v420_v6  ;;  %v515_v25 = vrot.slane %v420_v6, 7 }
 0x775   :  { %v1321_v7 = vpop.eup %1320 }
 0x776   :  { %423 = vrot.lane.b32.xlu0 %v1321_v7, %s1416_s0 }
 0x7e8   :  { %v424_v8 = vpop.permute.xlu0 %423 }
 0x7e9   :  { %v426_v9 = vmul.f32 %v1319_v61, %v424_v8 }
 0x7eb   :  { %v428_v11 = vrot.slane %v426_v9, 2 }
 0x7ed   :  { %429 = vrot.lane.b32.xlu1 %v428_v11, %s1417_s27 }
 0x85f   :  { %v430_v12 = vpop.permute.xlu1 %429 }
 0x860   :  { %1175 = vmatmul.mubr.msk.f32.vlgmr.msra.gmra.mrb[4].mxu0 %vm115_vm2, %v430_v12 }
 0x861   :  { %1267 = vmatpush3.bf16.msra.mxu0 %v1457_v5  ;;  %1196 = vmatprep.mubr.msk.f32.mxu0 %vm1414_vm0, %v1415_v1 }
 0x862   :  { %1268 = vmatprep.subr.bf16.mxu0 %v1413_v0 }
 0x865   :  { %1270 = vmatpush3.bf16.msra.mxu0 %v1460_v10 }
 0x866   :  { %1277 = vmatprep.subr.bf16.mxu0 %v1413_v0 }
 0x933   :  { %v499_v13 = vpop.f32.mrb[4].mxu0 }
 0x934   :  { %v504_v15 = vrot.slane %v499_v13, 5  ;;  %v1176_v16 = vpop.f32.mrb[5].mxu0 }
 0x936   :  { %v506_v17 = vadd.f32 %v504_v15, %v1482_v14 }
 0x938   :  { %1322 = vtanh.f32 %v506_v17  ;;  %v1068_v19 = vmul.f32 -1.442695, %v506_v17 }
 0x93a   :  { %1324 = vpow2.f32 %v1068_v19 }
 0x942   :  { %v1323_v18 = vpop.eup %1322 }
 0x943   :  { %519 = vrot.lane.b32.xlu0 %v1323_v18, %s1416_s0 }
 0x944   :  { %v1325_v20 = vpop.eup %1324 }
 0x945   :  { %v510_v21 = vadd.f32 1.0, %v1325_v20 }
 0x947   :  { %1326 = vrcp.f32 %v510_v21 }
 0x951   :  { %v1327_v22 = vpop.eup %1326 }
 0x952   :  { %v517_v26 = vmul.f32 %v1327_v22, %v515_v25 }
 0x9b5   :  { %v520_v23 = vpop.permute.xlu0 %519 }
 0x9b6   :  { %v522_v24 = vmul.f32 %v1327_v22, %v520_v23 }
 0x9b8   :  { %524 = vrot.lane.b32.xlu1 %v522_v24, %s1417_s27 }
 0xa2a   :  { %v525_v27 = vpop.permute.xlu1 %524 }
 0xa2b   :  { %v527_v28 = vadd.f32 %v525_v27, %v517_v26 }
 0xa2d   :  { %1328 = vtanh.f32 %v527_v28  ;;  %v622_v45 = vrot.slane %v527_v28, 7 }
 0xa37   :  { %v1329_v29 = vpop.eup %1328 }
 0xa38   :  { %530 = vrot.lane.b32.xlu0 %v1329_v29, %s1416_s0 }
 0xaaa   :  { %v531_v30 = vpop.permute.xlu0 %530 }
 0xaab   :  { %v533_v31 = vmul.f32 %v1327_v22, %v531_v30 }
 0xaad   :  { %v535_v32 = vrot.slane %v533_v31, 3 }
 0xaaf   :  { %536 = vrot.lane.b32.xlu1 %v535_v32, %s1417_s27 }
 0xb21   :  { %v537_v33 = vpop.permute.xlu1 %536 }
 0xb22   :  { %1186 = vmatmul.mubr.msk.f32.vlgmr.msra.gmra.mrb[4].mxu1 %vm115_vm2, %v537_v33 }
 0xb23   :  { %1273 = vmatpush3.bf16.msra.mxu1 %v1457_v5  ;;  %1207 = vmatprep.mubr.msk.f32.mxu1 %vm1414_vm0, %v1415_v1 }
 0xb24   :  { %1274 = vmatprep.subr.bf16.mxu1 %v1413_v0 }
 0xb27   :  { %1276 = vmatpush3.bf16.msra.mxu1 %v1460_v10 }
 0xb28   :  { %1283 = vmatprep.subr.bf16.mxu1 %v1413_v0 }
 0xbf5   :  { %v606_v34 = vpop.f32.mrb[4].mxu1 }
 0xbf6   :  { %v611_v35 = vrot.slane %v606_v34, 4  ;;  %v1187_v36 = vpop.f32.mrb[5].mxu1 }
 0xbf8   :  { %v613_v37 = vadd.f32 %v611_v35, %v1482_v14 }
 0xbfa   :  { %1330 = vtanh.f32 %v613_v37  ;;  %v1070_v39 = vmul.f32 -1.442695, %v613_v37 }
 0xbfc   :  { %1332 = vpow2.f32 %v1070_v39 }
 0xc04   :  { %v1331_v38 = vpop.eup %1330 }
 0xc05   :  { %626 = vrot.lane.b32.xlu0 %v1331_v38, %s1416_s0 }
 0xc06   :  { %v1333_v40 = vpop.eup %1332 }
 0xc07   :  { %v617_v41 = vadd.f32 1.0, %v1333_v40 }
 0xc09   :  { %1334 = vrcp.f32 %v617_v41 }
 0xc13   :  { %v1335_v42 = vpop.eup %1334 }
 0xc14   :  { %v624_v46 = vmul.f32 %v1335_v42, %v622_v45 }
 0xc77   :  { %v627_v43 = vpop.permute.xlu0 %626 }
 0xc78   :  { %v629_v44 = vmul.f32 %v1335_v42, %v627_v43 }
 0xc7a   :  { %631 = vrot.lane.b32.xlu1 %v629_v44, %s1417_s27 }
 0xcec   :  { %v632_v47 = vpop.permute.xlu1 %631 }
 0xced   :  { %v634_v48 = vadd.f32 %v632_v47, %v624_v46  ;;  %v963_v47 = vld [vmem:[%s1593_s2 + $0x8] sm:$0xff] }
 0xcef   :  { %1336 = vtanh.f32 %v634_v48 }
 0xcf9   :  { %v1337_v49 = vpop.eup %1336 }
 0xcfa   :  { %637 = vrot.lane.b32.xlu0 %v1337_v49, %s1416_s0 }
 0xd6c   :  { %v638_v50 = vpop.permute.xlu0 %637 }
 0xd6d   :  { %v640_v51 = vmul.f32 %v1335_v42, %v638_v50  ;;  %v965_v50 = vld [vmem:[%s1593_s2 + $0x18] sm:$0xff] }
 0xd6f   :  { %v642_v52 = vrot.slane %v640_v51, 4 }
 0xd71   :  { %643 = vrot.lane.b32.xlu1 %v642_v52, %s1417_s27 }
 0xde3   :  { %v644_v53 = vpop.permute.xlu1 %643 }
 0xde4   :  { %1197 = vmatmul.mubr.msk.f32.vlgmr.msra.gmra.mrb[6].mxu0 %vm115_vm2, %v644_v53 }
 0xde5   :  { %1279 = vmatpush3.bf16.msra.mxu0 %v1457_v5  ;;  %1218 = vmatprep.mubr.msk.f32.mxu0 %vm1414_vm0, %v1415_v1 }
 0xde6   :  { %1280 = vmatprep.subr.bf16.mxu0 %v1413_v0 }
 0xde9   :  { %1282 = vmatpush3.bf16.msra.mxu0 %v1460_v10  ;;  %v729_v10 = vrot.slane %v634_v48, 7  ;;  %v964_v48 = vld [vmem:[%s1593_s2 + $0x10] sm:$0xff] }
 0xdea   :  { %v1287_v51 = vpack.c.bf16 %v965_v50, %v964_v48 }
 0xeb7   :  { %v713_v54 = vpop.f32.mrb[6].mxu0 }
 0xeb8   :  { %v718_v55 = vrot.slane %v713_v54, 3  ;;  %v1198_v56 = vpop.f32.mrb[7].mxu0 }
 0xeba   :  { %v720_v57 = vadd.f32 %v718_v55, %v1482_v14 }
 0xebc   :  { %1338 = vtanh.f32 %v720_v57  ;;  %v1072_v59 = vmul.f32 -1.442695, %v720_v57  ;;  %v966_v57 = vld [vmem:[%s1593_s2 + $0x20] sm:$0x1] }
 0xebe   :  { %1340 = vpow2.f32 %v1072_v59 }
 0xec6   :  { %v1339_v58 = vpop.eup %1338 }
 0xec7   :  { %733 = vrot.lane.b32.xlu0 %v1339_v58, %s1416_s0 }
 0xec8   :  { %v1341_v60 = vpop.eup %1340 }
 0xec9   :  { %v724_v5 = vadd.f32 1.0, %v1341_v60 }
 0xecb   :  { %1342 = vrcp.f32 %v724_v5 }
 0xed5   :  { %v1343_v61 = vpop.eup %1342 }
 0xed6   :  { %v731_v2 = vmul.f32 %v1343_v61, %v729_v10 }
 0xf39   :  { %v734_v62 = vpop.permute.xlu0 %733 }
 0xf3a   :  { %v736_v63 = vmul.f32 %v1343_v61, %v734_v62 }
 0xf3c   :  { %738 = vrot.lane.b32.xlu1 %v736_v63, %s1417_s27 }
 0xfae   :  { %v739_v3 = vpop.permute.xlu1 %738 }
 0xfaf   :  { %v741_v4 = vadd.f32 %v739_v3, %v731_v2 }
 0xfb1   :  { %1344 = vtanh.f32 %v741_v4 }
 0xfbb   :  { %v1345_v6 = vpop.eup %1344 }
 0xfbc   :  { %744 = vrot.lane.b32.xlu0 %v1345_v6, %s1416_s0 }
0x102e   :  { %v745_v7 = vpop.permute.xlu0 %744 }
0x102f   :  { %v747_v8 = vmul.f32 %v1343_v61, %v745_v7 }
0x1031   :  { %v749_v9 = vrot.slane %v747_v8, 5 }
0x1033   :  { %750 = vrot.lane.b32.xlu1 %v749_v9, %s1417_s27 }
0x10a5   :  { %v751_v11 = vpop.permute.xlu1 %750 }
0x10a6   :  { %1208 = vmatmul.mubr.msk.f32.vlgmr.msra.gmra.mrb[6].mxu1 %vm115_vm2, %v751_v11 }
0x10a7   :  { %1229 = vmatprep.mubr.msk.f32.mxu1 %vm1414_vm0, %v1415_v1  ;;  %v836_v1 = vrot.slane %v741_v4, 7 }
0x1179   :  { %v820_v12 = vpop.f32.mrb[6].mxu1 }
0x117a   :  { %v825_v13 = vrot.slane %v820_v12, 2  ;;  %v1209_v15 = vpop.f32.mrb[7].mxu1 }
0x117c   :  { %v827_v16 = vadd.f32 %v825_v13, %v1482_v14 }
0x117e   :  { %1346 = vtanh.f32 %v827_v16  ;;  %v1074_v18 = vmul.f32 -1.442695, %v827_v16 }
0x1180   :  { %1348 = vpow2.f32 %v1074_v18 }
0x1188   :  { %v1347_v17 = vpop.eup %1346 }
0x1189   :  { %840 = vrot.lane.b32.xlu0 %v1347_v17, %s1416_s0 }
0x118a   :  { %v1349_v19 = vpop.eup %1348 }
0x118b   :  { %v831_v20 = vadd.f32 1.0, %v1349_v19 }
0x118d   :  { %1350 = vrcp.f32 %v831_v20 }
0x1197   :  { %v1351_v21 = vpop.eup %1350 }
0x1198   :  { %v838_v24 = vmul.f32 %v1351_v21, %v836_v1 }
0x11fb   :  { %v841_v22 = vpop.permute.xlu0 %840 }
0x11fc   :  { %v843_v23 = vmul.f32 %v1351_v21, %v841_v22 }
0x11fe   :  { %845 = vrot.lane.b32.xlu1 %v843_v23, %s1417_s27 }
0x1270   :  { %v846_v25 = vpop.permute.xlu1 %845 }
0x1271   :  { %v848_v26 = vadd.f32 %v846_v25, %v838_v24 }
0x1273   :  { %1352 = vtanh.f32 %v848_v26  ;;  %v943_v43 = vrot.slane %v848_v26, 7 }
0x127d   :  { %v1353_v27 = vpop.eup %1352 }
0x127e   :  { %851 = vrot.lane.b32.xlu0 %v1353_v27, %s1416_s0 }
0x12f0   :  { %v852_v28 = vpop.permute.xlu0 %851 }
0x12f1   :  { %v854_v29 = vmul.f32 %v1351_v21, %v852_v28 }
0x12f3   :  { %v856_v30 = vrot.slane %v854_v29, 6 }
0x12f5   :  { %857 = vrot.lane.b32.xlu1 %v856_v30, %s1417_s27 }
0x1367   :  { %v858_v31 = vpop.permute.xlu1 %857 }
0x1368   :  { %1219 = vmatmul.mubr.msk.f32.vlgmr.msra.gmra.mrb[8].mxu0 %vm115_vm2, %v858_v31 }
0x143b   :  { %v927_v32 = vpop.f32.mrb[8].mxu0 }
0x143c   :  { %v932_v33 = vrot.slane %v927_v32, 1  ;;  %v1220_v34 = vpop.f32.mrb[9].mxu0 }
0x143e   :  { %v934_v35 = vadd.f32 %v932_v33, %v1482_v14  ;;  %v962_v14 = vld [vmem:[%s1593_s2] sm:$0xff] }
0x143f   :  { %v1284_v49 = vpack.c.bf16 %v963_v47, %v962_v14 }
0x1440   :  { %1354 = vtanh.f32 %v934_v35  ;;  %v1076_v37 = vmul.f32 -1.442695, %v934_v35 }
0x1441   :  { %1285 = vmatpush3.bf16.msra.mxu1 %v1284_v49 }
0x1442   :  { %1356 = vpow2.f32 %v1076_v37  ;;  %1286 = vmatprep.subr.bf16.mxu1 %v1413_v0 }
0x1445   :  { %1288 = vmatpush3.bf16.msra.mxu1 %v1287_v51 }
0x144a   :  { %v1355_v36 = vpop.eup %1354 }
0x144b   :  { %947 = vrot.lane.b32.xlu0 %v1355_v36, %s1416_s0 }
0x144c   :  { %v1357_v38 = vpop.eup %1356 }
0x144d   :  { %v938_v39 = vadd.f32 1.0, %v1357_v38 }
0x144f   :  { %1358 = vrcp.f32 %v938_v39 }
0x1459   :  { %v1359_v40 = vpop.eup %1358 }
0x145a   :  { %v945_v44 = vmul.f32 %v1359_v40, %v943_v43 }
0x14bd   :  { %v948_v41 = vpop.permute.xlu0 %947 }
0x14be   :  { %v950_v42 = vmul.f32 %v1359_v40, %v948_v41 }
0x14c0   :  { %952 = vrot.lane.b32.xlu1 %v950_v42, %s1417_s27 }
0x1532   :  { %v953_v45 = vpop.permute.xlu1 %952 }
0x1533   :  { %v955_v46 = vadd.f32 %v953_v45, %v945_v44 }
0x1535   :  { %1360 = vtanh.f32 %v955_v46 }
0x153f   :  { %v1361_v52 = vpop.eup %1360 }
0x1540   :  { %958 = vrot.lane.b32.xlu0 %v1361_v52, %s1416_s0 }
0x15b2   :  { %v959_v53 = vpop.permute.xlu0 %958 }
0x15b3   :  { %v961_v54 = vmul.f32 %v1359_v40, %v959_v53 }
0x15b5   :  { %v968_v55 = vrot.slane %v961_v54, 7 }
0x15b7   :  { %969 = vrot.lane.b32.xlu1 %v968_v55, %s1417_s27 }
0x1629   :  { %v970_v56 = vpop.permute.xlu1 %969 }
0x162a   :  { %1230 = vmatmul.mubr.msk.f32.vlgmr.msra.gmra.mrb[8].mxu1 %vm115_vm2, %v970_v56 }
0x16fd   :  { %v1039_v58 = vpop.f32.mrb[8].mxu1 }
0x16fe   :  { %v1040_v0 = vadd.f32 %v1039_v58, %v966_v57  ;;  %v1231_v59 = vpop.f32.mrb[9].mxu1 }
0x1700   :  { %1044 = vst.msk [vmem:[#allocation5] sm:$0x1] %vm1043_vm3, %v1040_v0 }
0x1701   :  { %1395 = shalt.err (!%p1392_p12)
}
0x1702   :  { %s1396_s2 = scalar_lea.hbm %s1594_s3, 16 }
0x1703   :  { %p1397_p13 = scmp.ne.s32.totalorder %s1594_s3, %s1396_s2  ;;  %p1400_p0 = scmp.lt.u32.totalorder %s1396_s2, %s1594_s3 }
0x1705   :  { %p1402_p1 = pnand %p1400_p0, %p1397_p13 }
0x1707   :  { %1405 = shalt.err (!%p1402_p1)
}
0x1708   :  { %1054 = dma.vmem_to_hbm [thread:$0]  %s1052_s12, 16, %s1594_s3, [#allocation4]  }
0x1709   :  { %1408 = dma.done.wait [#allocation4], 16  }
0x170a   :  { %1409 = vsyncadd [#allocation4], 4294967280 }
0x170b   :  { %1058 = vsyncpa [#allocation3], 1 }
0x170c   :  { %1059 = vsyncpa [#allocation4], 1 }

</bundles_post_ra>
